<compile_context>
chip_gen: v5e
topology: v5e:2x2
jax: 0.10.0
libtpu: 0.0.40
codegen_flags: <defaults>
</compile_context>

<pallas_src>
import functools

import jax
import jax.numpy as jnp
from jax.experimental import pallas as pl
from jax.experimental.pallas import tpu as pltpu

EPS = 1e-5      # torch.nn.LayerNorm default
LANE = 128      # TPU vreg lane width
SUBLANE = 8     # TPU vreg sublane count


def _round_up(n, m):
    return ((n + m - 1) // m) * m


def _silu(x):
    return x * jax.nn.sigmoid(x)


def modulated_linact_kernel(x_ref, t_ref, w_mod_ref, b_mod_ref,
                            w_ff_ref, b_ff_ref, o_ref, *, c_in):
    """One batch tile: LayerNorm -> modulation -> Linear -> SiLU, fully fused."""
    c_in_p = x_ref.shape[-1]                       # padded channel count (static)

    # ---- LayerNorm stats over the TRUE channel count (padded columns are zero) ----
    x = x_ref[...].astype(jnp.float32)
    inv_n = 1.0 / c_in
    mean = jnp.sum(x, axis=-1, keepdims=True) * inv_n
    # biased variance via E[x^2] - mean^2 so zero-padded columns don't pollute it
    var = jnp.maximum(jnp.sum(x * x, axis=-1, keepdims=True) * inv_n - mean * mean, 0.0)
    xn = (x - mean) * jax.lax.rsqrt(var + EPS)     # un-affined LayerNorm

    # ---- modulation branch: one fused MXU matmul -> (mult | add) ----
    # gamma/beta are already folded into w_mod/b_mod at pack time:
    #   mult = gamma*(1+scale),  add = beta*(1+scale) + shift
    t = t_ref[...].astype(jnp.float32)
    t_act = _silu(t).astype(w_mod_ref.dtype)       # bf16 MXU operand, f32 accumulate
    mod = jnp.dot(t_act, w_mod_ref[...],
                  preferred_element_type=jnp.float32) + b_mod_ref[...]
    mult = mod[:, :c_in_p]                         # static, lane-aligned slices (no copy)
    add = mod[:, c_in_p:]

    y = xn * mult + add                            # single FMA pair on xn

    # ---- output projection + SiLU ----
    h = jnp.dot(y.astype(w_ff_ref.dtype), w_ff_ref[...],
                preferred_element_type=jnp.float32) + b_ff_ref[...]
    o_ref[...] = _silu(h).astype(o_ref.dtype)


def pack_params(params, mm_dtype=jnp.bfloat16):
    """One-time (outside the hot path) weight transpose / fuse / fold / pad / cast."""
    C_out, C_in = params["w_ff"].shape
    C_mod = params["w_mod"].shape[1]
    C_in_p = _round_up(C_in, LANE)
    C_out_p = _round_up(C_out, LANE)
    C_mod_p = _round_up(C_mod, LANE)

    gamma = params["gamma"].astype(jnp.float32)
    beta = params["beta"].astype(jnp.float32)
    w_shift_t = params["w_mod"][:C_in].T.astype(jnp.float32)   # [C_mod, C_in]
    w_scale_t = params["w_mod"][C_in:].T.astype(jnp.float32)   # [C_mod, C_in]
    b_shift = params["b_mod"][:C_in].astype(jnp.float32)
    b_scale = params["b_mod"][C_in:].astype(jnp.float32)

    # Fold the LayerNorm affine into the modulation branch (see header comment).
    w_mult_t = w_scale_t * gamma[None, :]
    b_mult = gamma * (1.0 + b_scale)
    w_add_t = w_shift_t + w_scale_t * beta[None, :]
    b_add = b_shift + beta * (1.0 + b_scale)

    pad2 = ((0, C_mod_p - C_mod), (0, C_in_p - C_in))
    pad1 = (0, C_in_p - C_in)
    # fused modulation weight: [C_mod_p, 2*C_in_p], mult columns first then add
    w_mod_t = jnp.concatenate([jnp.pad(w_mult_t, pad2),
                               jnp.pad(w_add_t, pad2)], axis=1).astype(mm_dtype)
    b_mod = jnp.concatenate([jnp.pad(b_mult, pad1),
                             jnp.pad(b_add, pad1)]).reshape(1, 2 * C_in_p).astype(jnp.float32)

    w_ff_t = jnp.pad(params["w_ff"].T,
                     ((0, C_in_p - C_in), (0, C_out_p - C_out))).astype(mm_dtype)
    b_ff = jnp.pad(params["b_ff"], (0, C_out_p - C_out)).reshape(1, C_out_p).astype(jnp.float32)

    return dict(w_mod_t=w_mod_t, b_mod=b_mod, w_ff_t=w_ff_t, b_ff=b_ff,
                C_in=C_in, C_out=C_out, C_mod=C_mod,
                C_in_p=C_in_p, C_out_p=C_out_p, C_mod_p=C_mod_p)


def modulated_linact(x, t, packed, *, tb=128):
    """Hot-path call: pad activations, launch the batch-tiled fused kernel."""
    B = x.shape[0]
    C_in, C_out, C_mod = packed["C_in"], packed["C_out"], packed["C_mod"]
    C_in_p, C_out_p, C_mod_p = packed["C_in_p"], packed["C_out_p"], packed["C_mod_p"]
    assert x.shape == (B, C_in) and t.shape == (B, C_mod)

    TB = _round_up(min(tb, _round_up(B, SUBLANE)), SUBLANE)
    B_pad = _round_up(B, TB)
    if (B_pad, C_in_p) != x.shape:
        x = jnp.pad(x, ((0, B_pad - B), (0, C_in_p - C_in)))
    if (B_pad, C_mod_p) != t.shape:
        t = jnp.pad(t, ((0, B_pad - B), (0, C_mod_p - C_mod)))

    grid = (pl.cdiv(B_pad, TB),)

    # VMEM budget: double-buffered activation tiles + resident weights + f32 temps.
    mm_itemsize = packed["w_ff_t"].dtype.itemsize
    est = (2 * TB * (C_in_p * x.dtype.itemsize
                     + C_mod_p * t.dtype.itemsize
                     + C_out_p * x.dtype.itemsize)
           + 2 * (C_mod_p * 2 * C_in_p + C_in_p * C_out_p) * mm_itemsize
           + 2 * SUBLANE * (2 * C_in_p + C_out_p) * 4
           + TB * (6 * C_in_p + C_mod_p + 2 * C_out_p) * 4)
    vmem_limit = int(min(max(2 * est, 32 * 1024 * 1024), 64 * 1024 * 1024))

    kernel = functools.partial(modulated_linact_kernel, c_in=float(C_in))

    out = pl.pallas_call(
        kernel,
        out_shape=jax.ShapeDtypeStruct((B_pad, C_out_p), x.dtype),
        grid=grid,
        in_specs=[
            pl.BlockSpec((TB, C_in_p), lambda i: (i, 0)),            # x tile (pipelined)
            pl.BlockSpec((TB, C_mod_p), lambda i: (i, 0)),           # t tile (pipelined)
            pl.BlockSpec((C_mod_p, 2 * C_in_p), lambda i: (0, 0)),   # fused mod weight (resident)
            pl.BlockSpec((1, 2 * C_in_p), lambda i: (0, 0)),         # fused mod bias (resident)
            pl.BlockSpec((C_in_p, C_out_p), lambda i: (0, 0)),       # ff weight (resident)
            pl.BlockSpec((1, C_out_p), lambda i: (0, 0)),            # ff bias (resident)
        ],
        out_specs=pl.BlockSpec((TB, C_out_p), lambda i: (i, 0)),     # lane-dense output
        compiler_params=pltpu.CompilerParams(
            dimension_semantics=("parallel",),
            vmem_limit_bytes=vmem_limit),
    )(x, t, packed["w_mod_t"], packed["b_mod"], packed["w_ff_t"], packed["b_ff"])

    # TODO(synk): if C_in*C_out weights outgrow VMEM headroom, add a second
    # "parallel" grid axis tiling C_out / w_ff instead of shrinking the batch tile.
    return out[:B, :C_out]


def modulated_linact_ref(x, t, params):
    """Pure-JAX f32 reference mirroring the PyTorch forward."""
    C_in = x.shape[1]
    mean = jnp.mean(x, axis=-1, keepdims=True)
    var = jnp.mean(jnp.square(x - mean), axis=-1, keepdims=True)
    xn = (x - mean) / jnp.sqrt(var + EPS) * params["gamma"] + params["beta"]
    mod = _silu(t) @ params["w_mod"].T + params["b_mod"]
    shift, scale = mod[:, :C_in], mod[:, C_in:]
    y = xn * (1.0 + scale) + shift
    return _silu(y @ params["w_ff"].T + params["b_ff"])


def init_params(key, input_ch, output_ch, modulation_ch):
    k = jax.random.split(key, 4)
    scale_ff = 1.0 / jnp.sqrt(input_ch)
    scale_mod = 1.0 / jnp.sqrt(modulation_ch)
    return {
        # ff: nn.Linear(input_ch, output_ch)
        "w_ff": jax.random.uniform(k[0], (output_ch, input_ch), jnp.float32, -scale_ff, scale_ff),
        "b_ff": jax.random.uniform(k[1], (output_ch,), jnp.float32, -scale_ff, scale_ff),
        # mod: nn.Linear(modulation_ch, 2*input_ch)
        "w_mod": jax.random.uniform(k[2], (2 * input_ch, modulation_ch), jnp.float32, -scale_mod, scale_mod),
        "b_mod": jax.random.uniform(k[3], (2 * input_ch,), jnp.float32, -scale_mod, scale_mod),
        # norm: nn.LayerNorm(input_ch) affine params (torch init: ones / zeros)
        "gamma": jnp.ones((input_ch,), jnp.float32),
        "beta": jnp.zeros((input_ch,), jnp.float32),
    }


def _run_case(key, B, C_IN, C_OUT, C_MOD, *, random_affine=False, tb=128):
    k_x, k_t, k_p, k_g, k_b = jax.random.split(key, 5)
    x = jax.random.normal(k_x, (B, C_IN), jnp.float32)
    t = jax.random.normal(k_t, (B, C_MOD), jnp.float32)
    params = init_params(k_p, C_IN, C_OUT, C_MOD)
    if random_affine:   # exercise the gamma/beta folding path
        params["gamma"] = 1.0 + 0.1 * jax.random.normal(k_g, (C_IN,), jnp.float32)
        params["beta"] = 0.1 * jax.random.normal(k_b, (C_IN,), jnp.float32)

    packed = pack_params(params)                    # one-time packing, outside hot path
    out = jax.block_until_ready(modulated_linact(x, t, packed, tb=tb))
    ref = modulated_linact_ref(x, t, params)
    assert out.shape == (B, C_OUT)
    # tolerance loosened because matmul operands are bf16 (accumulation stays f32)
    assert jnp.allclose(out, ref, atol=5e-2, rtol=5e-2), \
        f"kernel mismatch vs reference (max abs err {jnp.max(jnp.abs(out - ref))})"


if __name__ == "__main__":
    key = jax.random.PRNGKey(0)
    k0, k1 = jax.random.split(key)
    # small primary case (matches the module's typical per-token usage)
    _run_case(k0, B=8, C_IN=32, C_OUT=64, C_MOD=16)
    # multi-tile case: non-multiple batch + channel padding + random LayerNorm affine
    _run_case(k1, B=272, C_IN=192, C_OUT=320, C_MOD=96, random_affine=True)
    print("KERNEL_OK")
</pallas_src>

<mosaic_0001>
module attributes {stable_mosaic.version = 11 : i64} {
  func.func @modulated_linact_kernel(%arg0: i32, %arg1: memref<8x128xf32, #tpu.memory_space<vmem>>, %arg2: memref<8x128xf32, #tpu.memory_space<vmem>>, %arg3: memref<128x256xbf16, #tpu.memory_space<vmem>>, %arg4: memref<1x256xf32, #tpu.memory_space<vmem>>, %arg5: memref<128x128xbf16, #tpu.memory_space<vmem>>, %arg6: memref<1x128xf32, #tpu.memory_space<vmem>>, %arg7: memref<8x128xf32, #tpu.memory_space<vmem>>) attributes {dimension_semantics = [#tpu.dimension_semantics<parallel>], iteration_bounds = array<i64: 1>, scalar_prefetch = 0 : i64, scratch_operands = 0 : i64, tpu.core_type = #tpu.core_type<tc>, window_params = [{transform_indices = @transform_0, window_bounds = array<i64: 8, 128>}, {transform_indices = @transform_1, window_bounds = array<i64: 8, 128>}, {pipeline_mode = #tpu.pipeline_mode<synchronous>, transform_indices = @transform_2, window_bounds = array<i64: 128, 256>}, {pipeline_mode = #tpu.pipeline_mode<synchronous>, transform_indices = @transform_3, window_bounds = array<i64: 1, 256>}, {pipeline_mode = #tpu.pipeline_mode<synchronous>, transform_indices = @transform_4, window_bounds = array<i64: 128, 128>}, {pipeline_mode = #tpu.pipeline_mode<synchronous>, transform_indices = @transform_5, window_bounds = array<i64: 1, 128>}, {transform_indices = @transform_6, window_bounds = array<i64: 8, 128>}]} {
    %c0 = arith.constant 0 : index
    %c0_0 = arith.constant 0 : index
    %0 = vector.load %arg1[%c0, %c0_0] : memref<8x128xf32, #tpu.memory_space<vmem>>, vector<8x128xf32>
    %cst = arith.constant dense<0.000000e+00> : vector<8xf32>
    %1 = vector.multi_reduction <add>, %0, %cst [1] : vector<8x128xf32> to vector<8xf32>
    %2 = vector.shape_cast %1 : vector<8xf32> to vector<8x1xf32>
    %cst_1 = arith.constant 3.125000e-02 : f32
    %3 = vector.broadcast %cst_1 : f32 to vector<8x1xf32>
    %4 = arith.mulf %2, %3 : vector<8x1xf32>
    %5 = arith.mulf %0, %0 : vector<8x128xf32>
    %cst_2 = arith.constant dense<0.000000e+00> : vector<8xf32>
    %6 = vector.multi_reduction <add>, %5, %cst_2 [1] : vector<8x128xf32> to vector<8xf32>
    %7 = vector.shape_cast %6 : vector<8xf32> to vector<8x1xf32>
    %cst_3 = arith.constant 3.125000e-02 : f32
    %8 = vector.broadcast %cst_3 : f32 to vector<8x1xf32>
    %9 = arith.mulf %7, %8 : vector<8x1xf32>
    %10 = arith.mulf %4, %4 : vector<8x1xf32>
    %11 = arith.subf %9, %10 : vector<8x1xf32>
    %cst_4 = arith.constant 0.000000e+00 : f32
    %12 = vector.broadcast %cst_4 : f32 to vector<8x1xf32>
    %13 = arith.maximumf %11, %12 : vector<8x1xf32>
    %14 = vector.broadcast %4 : vector<8x1xf32> to vector<8x128xf32>
    %15 = arith.subf %0, %14 : vector<8x128xf32>
    %cst_5 = arith.constant 9.99999974E-6 : f32
    %16 = vector.broadcast %cst_5 : f32 to vector<8x1xf32>
    %17 = arith.addf %13, %16 : vector<8x1xf32>
    %18 = math.rsqrt %17 : vector<8x1xf32>
    %19 = vector.broadcast %18 : vector<8x1xf32> to vector<8x128xf32>
    %20 = arith.mulf %15, %19 : vector<8x128xf32>
    %c0_6 = arith.constant 0 : index
    %c0_7 = arith.constant 0 : index
    %21 = vector.load %arg2[%c0_6, %c0_7] : memref<8x128xf32, #tpu.memory_space<vmem>>, vector<8x128xf32>
    %22 = arith.negf %21 : vector<8x128xf32>
    %23 = math.exp %22 : vector<8x128xf32>
    %cst_8 = arith.constant 1.000000e+00 : f32
    %24 = vector.broadcast %cst_8 : f32 to vector<8x128xf32>
    %25 = arith.addf %24, %23 : vector<8x128xf32>
    %26 = arith.divf %24, %25 : vector<8x128xf32>
    %27 = arith.mulf %21, %26 : vector<8x128xf32>
    %28 = arith.truncf %27 : vector<8x128xf32> to vector<8x128xbf16>
    %c0_9 = arith.constant 0 : index
    %c0_10 = arith.constant 0 : index
    %29 = vector.load %arg3[%c0_9, %c0_10] : memref<128x256xbf16, #tpu.memory_space<vmem>>, vector<128x256xbf16>
    %cst_11 = arith.constant dense<0.000000e+00> : vector<8x256xf32>
    %30 = tpu.matmul %28, %29, %cst_11 {dimension_numbers = #tpu.dot_dimension_numbers<[1], [0], [0], [1], [0, 0, 1, 1], [], []>} : vector<8x128xbf16>, vector<128x256xbf16>, vector<8x256xf32> -> vector<8x256xf32>
    %c0_12 = arith.constant 0 : index
    %c0_13 = arith.constant 0 : index
    %31 = vector.load %arg4[%c0_12, %c0_13] : memref<1x256xf32, #tpu.memory_space<vmem>>, vector<1x256xf32>
    %32 = vector.broadcast %31 : vector<1x256xf32> to vector<8x256xf32>
    %33 = arith.addf %30, %32 : vector<8x256xf32>
    %34 = vector.extract_strided_slice %33 {offsets = [0, 0], sizes = [8, 128], strides = [1, 1]} : vector<8x256xf32> to vector<8x128xf32>
    %35 = vector.extract_strided_slice %33 {offsets = [0, 128], sizes = [8, 128], strides = [1, 1]} : vector<8x256xf32> to vector<8x128xf32>
    %36 = arith.mulf %20, %34 : vector<8x128xf32>
    %37 = arith.addf %36, %35 : vector<8x128xf32>
    %38 = arith.truncf %37 : vector<8x128xf32> to vector<8x128xbf16>
    %c0_14 = arith.constant 0 : index
    %c0_15 = arith.constant 0 : index
    %39 = vector.load %arg5[%c0_14, %c0_15] : memref<128x128xbf16, #tpu.memory_space<vmem>>, vector<128x128xbf16>
    %cst_16 = arith.constant dense<0.000000e+00> : vector<8x128xf32>
    %40 = tpu.matmul %38, %39, %cst_16 {dimension_numbers = #tpu.dot_dimension_numbers<[1], [0], [0], [1], [0, 0, 1, 1], [], []>} : vector<8x128xbf16>, vector<128x128xbf16>, vector<8x128xf32> -> vector<8x128xf32>
    %c0_17 = arith.constant 0 : index
    %c0_18 = arith.constant 0 : index
    %41 = vector.load %arg6[%c0_17, %c0_18] : memref<1x128xf32, #tpu.memory_space<vmem>>, vector<1x128xf32>
    %42 = vector.broadcast %41 : vector<1x128xf32> to vector<8x128xf32>
    %43 = arith.addf %40, %42 : vector<8x128xf32>
    %44 = arith.negf %43 : vector<8x128xf32>
    %45 = math.exp %44 : vector<8x128xf32>
    %cst_19 = arith.constant 1.000000e+00 : f32
    %46 = vector.broadcast %cst_19 : f32 to vector<8x128xf32>
    %47 = arith.addf %46, %45 : vector<8x128xf32>
    %48 = arith.divf %46, %47 : vector<8x128xf32>
    %49 = arith.mulf %43, %48 : vector<8x128xf32>
    %c0_20 = arith.constant 0 : index
    %c0_21 = arith.constant 0 : index
    %50 = vector.load %arg7[%c0_20, %c0_21] : memref<8x128xf32, #tpu.memory_space<vmem>>, vector<8x128xf32>
    tpu.vector_store %arg7[%c0_20, %c0_21], %49 {strides = array<i32>} : memref<8x128xf32, #tpu.memory_space<vmem>>, vector<8x128xf32>,
    return
  }
  func.func @transform_0(%arg0: i32) -> (i32, i32) {
    %c0_i32 = arith.constant 0 : i32
    %c0_i32_0 = arith.constant 0 : i32
    return %arg0, %c0_i32 : i32, i32
  }
  func.func @transform_1(%arg0: i32) -> (i32, i32) {
    %c0_i32 = arith.constant 0 : i32
    %c0_i32_0 = arith.constant 0 : i32
    return %arg0, %c0_i32 : i32, i32
  }
  func.func @transform_2(%arg0: i32) -> (i32, i32) {
    %c0_i32 = arith.constant 0 : i32
    %c0_i32_0 = arith.constant 0 : i32
    %c0_i32_1 = arith.constant 0 : i32
    return %c0_i32, %c0_i32_0 : i32, i32
  }
  func.func @transform_3(%arg0: i32) -> (i32, i32) {
    %c0_i32 = arith.constant 0 : i32
    %c0_i32_0 = arith.constant 0 : i32
    %c0_i32_1 = arith.constant 0 : i32
    return %c0_i32, %c0_i32_0 : i32, i32
  }
  func.func @transform_4(%arg0: i32) -> (i32, i32) {
    %c0_i32 = arith.constant 0 : i32
    %c0_i32_0 = arith.constant 0 : i32
    %c0_i32_1 = arith.constant 0 : i32
    return %c0_i32, %c0_i32_0 : i32, i32
  }
  func.func @transform_5(%arg0: i32) -> (i32, i32) {
    %c0_i32 = arith.constant 0 : i32
    %c0_i32_0 = arith.constant 0 : i32
    %c0_i32_1 = arith.constant 0 : i32
    return %c0_i32, %c0_i32_0 : i32, i32
  }
  func.func @transform_6(%arg0: i32) -> (i32, i32) {
    %c0_i32 = arith.constant 0 : i32
    %c0_i32_0 = arith.constant 0 : i32
    return %arg0, %c0_i32 : i32, i32
  }
}

</mosaic_0001>

<bundles_post_ra>
// kernel: tpu_custom_call.1
= control target key start
LH: loop header
LB: loop body
LE: loop exit
PB: predicated region body
PF: predicated region fallthrough
CT: control target
= control target key end

     0   :  { %11 = vsyncpa [#allocation3], 0  ;;  %s722_s0 = inlined_call_operand.hbm [shape: f32[8,128], index: 0, kind: input, shape index: {}]   ;;  %s723_s1 = inlined_call_operand.hbm [shape: f32[8,128], index: 1, kind: input, shape index: {}]   ;;  %s724_s2 = inlined_call_operand.hbm [shape: bf16[128,256], index: 2, kind: input, shape index: {}]   ;;  %s725_s3 = inlined_call_operand.vmem [shape: f32[1,256], index: 3, kind: input, shape index: {}]   ;;  %s726_s4 = inlined_call_operand.hbm [shape: bf16[128,128], index: 4, kind: input, shape index: {}]   ;;  %s727_s5 = inlined_call_operand.vmem [shape: f32[1,128], index: 5, kind: input, shape index: {}]   ;;  %s728_s6 = inlined_call_operand.hbm [shape: f32[8,128], index: 6, kind: output, shape index: {}]  }
   0x1   :  { %12 = vsyncpa [#allocation6], 0 }
   0x2   :  { %13 = vsyncpa [#allocation9], 0  ;;  %s31_s23 = sshll.u32 %s723_s1, 4  ;;  %s32_s23 = int_to_ptr.hbm [resolvable:$true] %s31_s23 }
   0x3   :  { %14 = vsyncpa [#allocation4], 0  ;;  %s651_s24 = smov [#allocation5]   ;;  %s20_s28 = sshll.u32 %s722_s0, 4  ;;  %s21_s28 = int_to_ptr.hbm [resolvable:$true] %s20_s28 }
   0x4   :  { %s33_s25 = sshll.u32 %s651_s24, 4  ;;  %s652_s29 = smov [#allocation2]   ;;  %s34_s25 = int_to_ptr.vmem [resolvable:$true] %s33_s25 }
   0x5   :  { %36 = dma.hbm_to_vmem [thread:$0]  %s32_s23, 128, %s34_s25, [#allocation6]  }
   0x6   :  { %s22_s30 = sshll.u32 %s652_s29, 4  ;;  %s41_s9 = sshll.u32 %s724_s2, 4  ;;  %s23_s30 = int_to_ptr.vmem [resolvable:$true] %s22_s30  ;;  %s42_s9 = int_to_ptr.hbm [resolvable:$true] %s41_s9 }
   0x7   :  { %25 = dma.hbm_to_vmem [thread:$0]  %s21_s28, 128, %s23_s30, [#allocation3]  }
   0x8   :  { %s653_s1 = smov [#allocation7]   ;;  %s56_s13 = sshll.u32 %s726_s4, 4  ;;  %s57_s13 = int_to_ptr.hbm [resolvable:$true] %s56_s13 }
   0x9   :  { %s43_s10 = sshll.u32 %s653_s1, 4  ;;  %s654_s14 = smov 128   ;;  %s44_s10 = int_to_ptr.vmem [resolvable:$true] %s43_s10 }
   0xa   :  { %s655_s0 = smov 8   ;;  %s656_s15 = smov [#allocation8]  }
   0xb   :  { %49 = dma.hbm_to_vmem [thread:$0]  %s42_s9, 2048, %s44_s10, [#allocation6], %s654_s14, %s654_s14, %s655_s0  }
   0xc   :  { %s58_s16 = sshll.u32 %s656_s15, 4  ;;  %s657_s17 = smov 64   ;;  %s59_s16 = int_to_ptr.vmem [resolvable:$true] %s58_s16 }
   0xd   :  { %s658_s18 = smov 4  }
   0xe   :  { %64 = dma.hbm_to_vmem [thread:$0]  %s57_s13, 1024, %s59_s16, [#allocation9], %s657_s17, %s657_s17, %s658_s18  }
   0xf   :  { %643 = dma.done.wait [#allocation3], 128  }
  0x10   :  { %644 = vsyncadd [#allocation3], 4294967168 }
  0x11   :  { %645 = dma.done.wait [#allocation6], 2176  }
  0x12   :  { %646 = vsyncadd [#allocation6], 4294965120 }
  0x13   :  { %647 = dma.done.wait [#allocation9], 1024  }
  0x14   :  { %648 = vsyncadd [#allocation9], 4294966272  ;;  %v707_v0 = vld [vmem:[#allocation2] sm:$0xff]  ;;  %v494_v2 = vld [vmem:[#allocation7 + $0x74] sm:$0xf0]  ;;  %s369_s23 = sshll.u32 %s728_s6, 4  ;;  %s370_s23 = int_to_ptr.hbm [resolvable:$true] %s369_s23 }
  0x15   :  { %v440_v1 = vld [vmem:[#allocation7 + $0x70] sm:$0xf]  ;;  %84 = vadd.xlane.f32.xlu0 %v707_v0  ;;  %v493_v4 = vld [vmem:[#allocation7 + $0x74] sm:$0xf]  ;;  %v442_v5 = vld [vmem:[#allocation7 + $0x78] sm:$0xf0]  ;;  %v87_v15 = vmul.f32 %v707_v0, %v707_v0 }
  0x16   :  { %v441_v3 = vor.u32 %v494_v2, %v440_v1  ;;  %v432_v6 = vld [vmem:[#allocation7 + $0x60] sm:$0xf]  ;;  %v445_v7 = vor.u32 %v493_v4, %v442_v5  ;;  %v492_v8 = vld [vmem:[#allocation7 + $0x64] sm:$0xf0]  ;;  %v491_v9 = vld [vmem:[#allocation7 + $0x64] sm:$0xf] }
  0x17   :  { %v434_v10 = vld [vmem:[#allocation7 + $0x68] sm:$0xf0]  ;;  %v433_v11 = vor.u32 %v492_v8, %v432_v6  ;;  %v424_v13 = vld [vmem:[#allocation7 + $0x50] sm:$0xf]  ;;  %v490_v14 = vld [vmem:[#allocation7 + $0x54] sm:$0xf0] }
  0x18   :  { %231 = vmatpush.bf16.msra.mxu0 %v441_v3  ;;  %244 = vmatpush.bf16.msra.mxu1 %v445_v7  ;;  %v437_v12 = vor.u32 %v491_v9, %v434_v10  ;;  %v489_v16 = vld [vmem:[#allocation7 + $0x54] sm:$0xf]  ;;  %v426_v17 = vld [vmem:[#allocation7 + $0x58] sm:$0xf0]  ;;  %v425_v18 = vor.u32 %v490_v14, %v424_v13  ;;  %v416_v20 = vld [vmem:[#allocation7 + $0x40] sm:$0xf] }
  0x19   :  { %v429_v19 = vor.u32 %v489_v16, %v426_v17  ;;  %v488_v21 = vld [vmem:[#allocation7 + $0x44] sm:$0xf0]  ;;  %v487_v22 = vld [vmem:[#allocation7 + $0x44] sm:$0xf]  ;;  %v418_v23 = vld [vmem:[#allocation7 + $0x48] sm:$0xf0] }
  0x1a   :  { %v417_v24 = vor.u32 %v488_v21, %v416_v20  ;;  %v107_v25 = vld [vmem:[#allocation5] sm:$0xff]  ;;  %v421_v26 = vor.u32 %v487_v22, %v418_v23  ;;  %v408_v27 = vld [vmem:[#allocation7 + $0x30] sm:$0xf]  ;;  %v485_v30 = vld [vmem:[#allocation7 + $0x34] sm:$0xf] }
  0x1b   :  { %v486_v28 = vld [vmem:[#allocation7 + $0x34] sm:$0xf0]  ;;  %v381_v29 = vmul.f32 -1.442695, %v107_v25  ;;  %v410_v31 = vld [vmem:[#allocation7 + $0x38] sm:$0xf0] }
  0x1c   :  { %232 = vmatpush.bf16.msra.mxu0 %v433_v11  ;;  %245 = vmatpush.bf16.msra.mxu1 %v437_v12  ;;  %v409_v32 = vor.u32 %v486_v28, %v408_v27  ;;  %v413_v33 = vor.u32 %v485_v30, %v410_v31  ;;  %v400_v34 = vld [vmem:[#allocation7 + $0x20] sm:$0xf]  ;;  %v484_v35 = vld [vmem:[#allocation7 + $0x24] sm:$0xf0]  ;;  %v483_v36 = vld [vmem:[#allocation7 + $0x24] sm:$0xf] }
  0x1d   :  { %88 = vadd.xlane.f32.xlu0 %v87_v15  ;;  %513 = vpow2.f32 %v381_v29  ;;  %v402_v37 = vld [vmem:[#allocation7 + $0x28] sm:$0xf0]  ;;  %v401_v38 = vor.u32 %v484_v35, %v400_v34  ;;  %v392_v41 = vld [vmem:[#allocation7 + $0x10] sm:$0xf]  ;;  %v482_v42 = vld [vmem:[#allocation7 + $0x14] sm:$0xf0] }
  0x1e   :  { %v405_v40 = vor.u32 %v483_v36, %v402_v37  ;;  %v481_v43 = vld [vmem:[#allocation7 + $0x14] sm:$0xf]  ;;  %v394_v44 = vld [vmem:[#allocation7 + $0x18] sm:$0xf0]  ;;  %v393_v46 = vor.u32 %v482_v42, %v392_v41  ;;  %v384_v48 = vld [vmem:[#allocation7] sm:$0xf] }
  0x1f   :  { %v397_v47 = vor.u32 %v481_v43, %v394_v44  ;;  %v480_v49 = vld [vmem:[#allocation7 + $0x4] sm:$0xf0]  ;;  %v479_v50 = vld [vmem:[#allocation7 + $0x4] sm:$0xf]  ;;  %v386_v51 = vld [vmem:[#allocation7 + $0x8] sm:$0xf0] }
  0x20   :  { %233 = vmatpush.bf16.msra.mxu0 %v425_v18  ;;  %246 = vmatpush.bf16.msra.mxu1 %v429_v19  ;;  %v385_v52 = vor.u32 %v480_v49, %v384_v48  ;;  %v389_v53 = vor.u32 %v479_v50, %v386_v51  ;;  %v502_v3 = vld [vmem:[#allocation8 + $0x38] sm:$0xff]  ;;  %v501_v4 = vld [vmem:[#allocation8 + $0x30] sm:$0xff]  ;;  %v500_v7 = vld [vmem:[#allocation8 + $0x28] sm:$0xff] }
  0x21   :  { %328 = vmatpush.bf16.msra.mxu2 %v502_v3  ;;  %v499_v9 = vld [vmem:[#allocation8 + $0x20] sm:$0xff]  ;;  %v498_v13 = vld [vmem:[#allocation8 + $0x18] sm:$0xff]  ;;  %v497_v15 = vld [vmem:[#allocation8 + $0x10] sm:$0xff] }
  0x22   :  { %v496_v17 = vld [vmem:[#allocation8 + $0x8] sm:$0xff]  ;;  %v495_v18 = vld [vmem:[#allocation8] sm:$0xff] }
  0x23   :  { %v514_v39 = vpop.eup %513 }
  0x24   :  { %234 = vmatpush.bf16.msra.mxu0 %v417_v24  ;;  %247 = vmatpush.bf16.msra.mxu1 %v421_v26  ;;  %v111_v45 = vadd.f32 1.0, %v514_v39 }
  0x25   :  { %329 = vmatpush.bf16.msra.mxu2 %v501_v4 }
  0x26   :  { %515 = vrcp.f32 %v111_v45  ;;  %v123_v56 = vand.u32 2147483648, %v111_v45  ;;  %vm117_vm0 = vweird.f32 %v111_v45  ;;  %v121_v58 = vand.u32 2147483647, %v111_v45 }
  0x28   :  { %235 = vmatpush.bf16.msra.mxu0 %v409_v32  ;;  %248 = vmatpush.bf16.msra.mxu1 %v413_v33  ;;  %v124_v60 = vor.u32 1.1754944e-38, %v123_v56  ;;  %vm122_vm3 = vcmp.eq.f32.partialorder %v121_v58, 8.507059e+37 }
  0x29   :  { %330 = vmatpush.bf16.msra.mxu2 %v500_v7 }
  0x2c   :  { %236 = vmatpush.bf16.msra.mxu0 %v401_v38  ;;  %249 = vmatpush.bf16.msra.mxu1 %v405_v40  ;;  %v516_v54 = vpop.eup %515  ;;  %v512_v40 = vld [vmem:[%s727_s5] ss:$0 sm:$0xff]  ;;  %s659_s5 = smov [#allocation10]  }
  0x2d   :  { %v113_v55 = vmul.f32 %v516_v54, %v111_v45  ;;  %vm118_vm1 = vweird.f32 %v516_v54  ;;  %331 = vmatpush.bf16.msra.mxu2 %v499_v9  ;;  %s367_s20 = sshll.u32 %s659_s5, 4  ;;  %s368_s20 = int_to_ptr.vmem [resolvable:$true] %s367_s20 }
  0x2e   :  { %vm119_vm2 = vmor %vm117_vm0, %vm118_vm1 }
  0x2f   :  { %v114_v57 = vsub.f32 1.0, %v113_v55 }
  0x30   :  { %237 = vmatpush.bf16.msra.mxu0 %v393_v46  ;;  %250 = vmatpush.bf16.msra.mxu1 %v397_v47 }
  0x31   :  { %v115_v59 = vmul.f32 %v516_v54, %v114_v57  ;;  %332 = vmatpush.bf16.msra.mxu2 %v498_v13 }
  0x33   :  { %v116_v61 = vadd.f32 %v516_v54, %v115_v59 }
  0x34   :  { %238 = vmatpush.bf16.msra.mxu0 %v385_v52  ;;  %251 = vmatpush.bf16.msra.mxu1 %v389_v53 }
  0x35   :  { %v120_v62 = vsel %vm119_vm2, %v516_v54, %v116_v61  ;;  %333 = vmatpush.bf16.msra.mxu2 %v497_v15 }
  0x36   :  { %v125_v63 = vsel %vm122_vm3, %v124_v60, %v120_v62 }
  0x37   :  { %v127_v1 = vmul.f32 %v125_v63, %v107_v25  ;;  %v145_v25 = vld [vmem:[%s725_s3] sm:$0x3] }
  0x38   :  { %v147_v26 = vperm.slane %v145_v25, 0  ;;  %v148_v27 = vperm.slane %v145_v25, 1 }
  0x39   :  { %v128_v2 = vpack.c.bf16 %v127_v1, %v127_v1  ;;  %334 = vmatpush.bf16.msra.mxu2 %v496_v17 }
  0x3b   :  { %239 = vmatmul.bf16.vlgmr.msra.gmra.mxu0 %v128_v2  ;;  %252 = vmatmul.bf16.vlgmr.msra.gmra.mxu1 %v128_v2 }
  0x3d   :  { %335 = vmatpush.bf16.msra.mxu2 %v495_v18 }
  0x88   :  { %v85_v5 = vpop.xlane.xlu0 %84 }
  0x89   :  { %v86_v6 = vmul.f32 0.03125, %v85_v5 }
  0x8b   :  { %v91_v8 = vmul.f32 %v86_v6, %v86_v6  ;;  %v94_v29 = vsub.f32 %v707_v0, %v86_v6 }
  0x90   :  { %v89_v10 = vpop.xlane.xlu0 %88 }
  0x91   :  { %v90_v11 = vmul.f32 0.03125, %v89_v10 }
  0x93   :  { %v92_v12 = vsub.f32 %v90_v11, %v91_v8 }
  0x95   :  { %v93_v14 = vmax.f32 %v92_v12, 0.0 }
  0x97   :  { %v95_v16 = vadd.f32 1e-05, %v93_v14 }
  0x99   :  { %517 = vrsqrt.f32 %v95_v16  ;;  %vm102_vm5 = vweird.f32 %v95_v16 }
  0x9f   :  { %v518_v19 = vpop.eup %517 }
  0xa0   :  { %v97_v20 = vmul.f32 %v518_v19, %v95_v16  ;;  %vm103_vm4 = vweird.f32 %v518_v19 }
  0xa1   :  { %vm104_vm6 = vmor %vm102_vm5, %vm103_vm4 }
  0xa2   :  { %v98_v21 = vmul.f32 %v518_v19, %v97_v20 }
  0xa4   :  { %v99_v22 = vmul.f32 0.5, %v98_v21 }
  0xa6   :  { %v100_v23 = vsub.f32 1.5, %v99_v22 }
  0xa8   :  { %v101_v24 = vmul.f32 %v518_v19, %v100_v23 }
  0xaa   :  { %v105_v28 = vsel %vm104_vm6, %v518_v19, %v101_v24 }
  0xab   :  { %v106_v32 = vmul.f32 %v105_v28, %v94_v29 }
  0xb8   :  { %v240_v30 = vpop.f32.mrf.mxu0  ;;  %v253_v31 = vpop.f32.mrf.mxu1 }
  0xb9   :  { %v241_v33 = vadd.f32 %v240_v30, %v147_v26  ;;  %v254_v34 = vadd.f32 %v253_v31, %v148_v27 }
  0xbb   :  { %v257_v35 = vmul.f32 %v241_v33, %v106_v32 }
  0xbd   :  { %v258_v36 = vadd.f32 %v257_v35, %v254_v34 }
  0xbf   :  { %v259_v37 = vpack.c.bf16 %v258_v36, %v258_v36 }
  0xc0   :  { %v242_v38 = vpop.f32.mrf.mxu0  ;;  %v255_v39 = vpop.f32.mrf.mxu1 }
  0xc1   :  { %336 = vmatmul.bf16.vlgmr.msra.gmra.mxu2 %v259_v37 }
 0x144   :  { %v337_v41 = vpop.f32.mrf.mxu2 }
 0x145   :  { %v338_v42 = vadd.f32 %v512_v40, %v337_v41 }
 0x147   :  { %v478_v43 = vmul.f32 -1.442695, %v338_v42 }
 0x149   :  { %519 = vpow2.f32 %v478_v43 }
 0x14c   :  { %v339_v0 = vpop.f32.mrf.mxu2 }
 0x14f   :  { %v520_v44 = vpop.eup %519 }
 0x150   :  { %v344_v45 = vadd.f32 1.0, %v520_v44 }
 0x152   :  { %521 = vrcp.f32 %v344_v45  ;;  %v356_v49 = vand.u32 2147483648, %v344_v45  ;;  %v354_v51 = vand.u32 2147483647, %v344_v45  ;;  %vm350_vm8 = vweird.f32 %v344_v45 }
 0x154   :  { %v357_v53 = vor.u32 1.1754944e-38, %v356_v49  ;;  %vm355_vm10 = vcmp.eq.f32.partialorder %v354_v51, 8.507059e+37 }
 0x158   :  { %v522_v46 = vpop.eup %521 }
 0x159   :  { %v346_v47 = vmul.f32 %v522_v46, %v344_v45  ;;  %vm351_vm7 = vweird.f32 %v522_v46 }
 0x15a   :  { %vm352_vm9 = vmor %vm350_vm8, %vm351_vm7 }
 0x15b   :  { %v347_v48 = vsub.f32 1.0, %v346_v47 }
 0x15d   :  { %v348_v50 = vmul.f32 %v522_v46, %v347_v48 }
 0x15f   :  { %v349_v52 = vadd.f32 %v522_v46, %v348_v50 }
 0x161   :  { %v353_v54 = vsel %vm352_vm9, %v522_v46, %v349_v52 }
 0x162   :  { %v358_v55 = vsel %vm355_vm10, %v357_v53, %v353_v54 }
 0x163   :  { %v360_v56 = vmul.f32 %v358_v55, %v338_v42 }
 0x165   :  { %361 = vst [vmem:[#allocation10] sm:$0xff] %v360_v56 }
 0x166   :  { %372 = dma.vmem_to_hbm [thread:$0]  %s368_s20, 128, %s370_s23, [#allocation4]  }
 0x167   :  { %649 = dma.done.wait [#allocation4], 128  }
 0x168   :  { %650 = vsyncadd [#allocation4], 4294967168 }
 0x169   :  { %377 = vsyncpa [#allocation3], 1 }
 0x16a   :  { %378 = vsyncpa [#allocation6], 1 }
 0x16b   :  { %379 = vsyncpa [#allocation9], 1 }
 0x16c   :  { %380 = vsyncpa [#allocation4], 1 }

</bundles_post_ra>
